<compile_context>
chip_gen: v6e
topology: v6e:2x2x1
jax: 0.10.0
libtpu: 0.0.40
codegen_flags: <defaults>
</compile_context>

<pallas_src>
import functools
import math

import jax
import jax.numpy as jnp
from jax import lax
from jax.experimental import pallas as pl
from jax.experimental.pallas import tpu as pltpu

_VMEM_LIMIT = 32 << 20  # 32 MiB: safe on v7x (64 MiB physical), ample on v5e/v6e.


def _round_up(x, m):
    return ((x + m - 1) // m) * m


def _pick_tile(dim, preferred, align):
    """Largest `align`-multiple tile <= preferred that divides dim, else full dim."""
    if dim <= preferred:
        return dim  # full-extent block is always a legal BlockSpec
    cand = (preferred // align) * align
    while cand >= align:
        if dim % cand == 0:
            return cand
        cand -= align
    return dim


# ---------------------------------------------------------------------------
# Kernel 1: tiled dense layer  y = x @ W + b
#   x: [M, K] f32 or bf16 (cast to bf16 in-kernel), W: [K, N] bf16, b: [1, N] f32
# ---------------------------------------------------------------------------
def _linear_kernel(x_ref, w_ref, b_ref, o_ref, acc_ref):
    k = pl.program_id(2)

    @pl.when(k == 0)
    def _():
        acc_ref[...] = jnp.zeros_like(acc_ref)

    # Cast fused in-kernel (VPU filler under the MXU); no-op if x is already bf16.
    acc_ref[...] += jnp.dot(x_ref[...].astype(jnp.bfloat16), w_ref[...],
                            preferred_element_type=jnp.float32)

    @pl.when(k == pl.num_programs(2) - 1)
    def _():
        o_ref[...] = (acc_ref[...] + b_ref[...]).astype(o_ref.dtype)


def linear_pallas(x2d, w_t, b2d, out_dtype, *, tm=256, tn=256, tk=512):
    """x2d: [M, K] f32/bf16; w_t: [K, N] bf16 (pre-transposed); b2d: [1, N] f32."""
    M, K = x2d.shape
    N = w_t.shape[1]

    # Predictable row tile: pad M instead of falling back to a full-extent block.
    tm_use = min(tm, _round_up(M, 8))
    Mp = _round_up(M, tm_use)
    if Mp != M:
        x2d = jnp.pad(x2d, ((0, Mp - M), (0, 0)))

    tn_use = _pick_tile(N, tn, 128)   # last dims: multiples of 128 (or full)
    tk_use = _pick_tile(K, tk, 128)   # single-pass reduction (tk = K) for typical H

    grid = (Mp // tm_use, N // tn_use, K // tk_use)
    out = pl.pallas_call(
        _linear_kernel,
        out_shape=jax.ShapeDtypeStruct((Mp, N), out_dtype),
        grid_spec=pltpu.PrefetchScalarGridSpec(
            num_scalar_prefetch=0,
            grid=grid,
            in_specs=[
                pl.BlockSpec((tm_use, tk_use), lambda i, j, k: (i, k)),
                pl.BlockSpec((tk_use, tn_use), lambda i, j, k: (k, j)),
                pl.BlockSpec((1, tn_use), lambda i, j, k: (0, j)),
            ],
            out_specs=pl.BlockSpec((tm_use, tn_use), lambda i, j, k: (i, j)),
            scratch_shapes=[pltpu.VMEM((tm_use, tn_use), jnp.float32)],
        ),
        compiler_params=pltpu.CompilerParams(
            dimension_semantics=("parallel", "parallel", "arbitrary"),
            vmem_limit_bytes=_VMEM_LIMIT),
    )(x2d, w_t, b2d)
    return out[:M] if Mp != M else out


# ---------------------------------------------------------------------------
# Kernel 2: attention for one (batch, q-tile) grid step, all heads.
#   Q/K/V stay in [B, L, H] layout; heads are static column slices of H.
#   Q is pre-scaled by 1/sqrt(head_dim) (folded into the projection weights).
# ---------------------------------------------------------------------------
def _attention_kernel(q_ref, k_ref, v_ref, o_ref, acc_ref, *, num_heads, head_dim):
    q = q_ref[0]      # [tq, H] bf16 (already scaled)
    k = k_ref[0]      # [Lk, H] bf16
    v = v_ref[0]      # [Lk, H] bf16
    for h in range(num_heads):                       # static unroll over heads
        lo = h * head_dim
        hi = lo + head_dim
        qh, kh, vh = q[:, lo:hi], k[:, lo:hi], v[:, lo:hi]
        # NT contraction over head_dim on both operands -> no k.T materialization.
        s = lax.dot_general(qh, kh,
                            dimension_numbers=(((1,), (1,)), ((), ())),
                            preferred_element_type=jnp.float32)       # [tq, Lk] f32
        s = s - jnp.max(s, axis=-1, keepdims=True)
        p = jnp.exp(s)
        denom = jnp.sum(p, axis=-1, keepdims=True)                    # [tq, 1]
        out_h = jnp.dot(p.astype(vh.dtype), vh,
                        preferred_element_type=jnp.float32)           # [tq, hd] f32
        # Deferred softmax normalization on the small PV result; per-head result
        # written straight to VMEM scratch (bounds the live set to one head).
        acc_ref[:, lo:hi] = out_h * pl.reciprocal(denom, approx=True)
    # Single lane-dense store, already in [B, L, H] head-concatenated layout.
    o_ref[0] = acc_ref[...].astype(o_ref.dtype)


def attention_pallas(q_arr, k_arr, v_arr, q_col, k_col, v_col,
                     Lq, Lk, hid_dim, num_heads, head_dim, out_dtype, *, tq=512):
    """q_arr/k_arr/v_arr: [B, L, W] with W = H (or 3H for the fused-QKV path);
    q_col/k_col/v_col select the H-wide column block (0 for plain Q/K/V; 0/1/2
    to read Q, K, V directly out of a fused [B, L, 3H] projection)."""
    B = q_arr.shape[0]
    tq_use = _pick_tile(Lq, tq, 8)
    kern = functools.partial(_attention_kernel,
                             num_heads=num_heads, head_dim=head_dim)
    return pl.pallas_call(
        kern,
        out_shape=jax.ShapeDtypeStruct((B, Lq, hid_dim), out_dtype),
        grid_spec=pltpu.PrefetchScalarGridSpec(
            num_scalar_prefetch=0,
            grid=(B, Lq // tq_use),
            in_specs=[
                pl.BlockSpec((1, tq_use, hid_dim),
                             lambda b, qi, c=q_col: (b, qi, c)),
                # K/V index maps ignore the q-tile index -> blocks stay resident.
                pl.BlockSpec((1, Lk, hid_dim),
                             lambda b, qi, c=k_col: (b, 0, c)),
                pl.BlockSpec((1, Lk, hid_dim),
                             lambda b, qi, c=v_col: (b, 0, c)),
            ],
            out_specs=pl.BlockSpec((1, tq_use, hid_dim),
                                   lambda b, qi: (b, qi, 0)),
            scratch_shapes=[pltpu.VMEM((tq_use, hid_dim), jnp.float32)],
        ),
        compiler_params=pltpu.CompilerParams(
            dimension_semantics=("parallel", "parallel"),
            vmem_limit_bytes=_VMEM_LIMIT),
    )(q_arr, k_arr, v_arr)


# ---------------------------------------------------------------------------
# Module wrapper
# ---------------------------------------------------------------------------
class MultiheadAttentionPallas:
    def __init__(self, hid_dim, num_heads, key, dropout=0.1):
        assert hid_dim % num_heads == 0
        self.hid_dim = hid_dim
        self.n_heads = num_heads
        self.head_dim = hid_dim // num_heads
        self.scale = math.sqrt(float(self.head_dim))

        ks = jax.random.split(key, 8)
        bound = 1.0 / math.sqrt(hid_dim)  # nn.Linear default init range

        def init_linear(kw, kb):
            w = jax.random.uniform(kw, (hid_dim, hid_dim), jnp.float32, -bound, bound)
            b = jax.random.uniform(kb, (hid_dim,), jnp.float32, -bound, bound)
            return w, b

        # Reference (PyTorch-layout, f32) parameters.
        self.wq, self.bq = init_linear(ks[0], ks[1])
        self.wk, self.bk = init_linear(ks[2], ks[3])
        self.wv, self.bv = init_linear(ks[4], ks[5])
        self.wo, self.bo = init_linear(ks[6], ks[7])

        # Kernel-side parameters, precomputed once (transposed, bf16, scale folded into Q).
        inv_scale = 1.0 / self.scale
        wq_t_scaled = self.wq.T * inv_scale                       # [H, H] f32
        self.wq_t = wq_t_scaled.astype(jnp.bfloat16)
        self.wk_t = self.wk.T.astype(jnp.bfloat16)
        self.wv_t = self.wv.T.astype(jnp.bfloat16)
        self.wo_t = self.wo.T.astype(jnp.bfloat16)
        self.bq2 = (self.bq * inv_scale).reshape(1, hid_dim)
        self.bk2 = self.bk.reshape(1, hid_dim)
        self.bv2 = self.bv.reshape(1, hid_dim)
        self.bo2 = self.bo.reshape(1, hid_dim)
        # Fused QKV projection weights for the self-attention path.
        self.wqkv_t = jnp.concatenate(
            [wq_t_scaled, self.wk.T, self.wv.T], axis=1).astype(jnp.bfloat16)   # [H, 3H]
        self.bqkv2 = jnp.concatenate(
            [self.bq * inv_scale, self.bk, self.bv]).reshape(1, 3 * hid_dim)

    def __call__(self, query, key, value):
        B, Lq, H = query.shape
        Lk = key.shape[1]

        # Trace-time identity check: equal-but-distinct arrays take the 3-GEMM path
        # (same numerics, just slower).
        if (query is key) and (key is value):
            # Self-attention: one fused [H, 3H] projection GEMM (f32->bf16 cast in-kernel).
            qkv = linear_pallas(query.reshape(B * Lq, H), self.wqkv_t, self.bqkv2,
                                jnp.bfloat16).reshape(B, Lq, 3 * H)
            if H % 128 == 0:
                # Feed the fused QKV array directly; BlockSpecs pick the Q/K/V column
                # windows (block indices 0/1/2) -> no wrapper-side slices / HBM round trip.
                ctx = attention_pallas(qkv, qkv, qkv, 0, 1, 2,
                                       Lq, Lk, H, self.n_heads, self.head_dim,
                                       jnp.bfloat16)
            else:
                Q = qkv[..., :H]
                K = qkv[..., H:2 * H]
                V = qkv[..., 2 * H:]
                ctx = attention_pallas(Q, K, V, 0, 0, 0,
                                       Lq, Lk, H, self.n_heads, self.head_dim,
                                       jnp.bfloat16)
        else:
            Q = linear_pallas(query.reshape(B * Lq, H),
                              self.wq_t, self.bq2, jnp.bfloat16).reshape(B, Lq, H)
            K = linear_pallas(key.reshape(B * Lk, H),
                              self.wk_t, self.bk2, jnp.bfloat16).reshape(B, Lk, H)
            V = linear_pallas(value.reshape(B * Lk, H),
                              self.wv_t, self.bv2, jnp.bfloat16).reshape(B, Lk, H)
            ctx = attention_pallas(Q, K, V, 0, 0, 0,
                                   Lq, Lk, H, self.n_heads, self.head_dim,
                                   jnp.bfloat16)

        # Output projection (f32 result, matching the module's dtype).
        out = linear_pallas(ctx.reshape(B * Lq, H), self.wo_t, self.bo2, jnp.float32)
        return out.reshape(B, Lq, H)


# ---------------------------------------------------------------------------
# Pure-JAX f32 reference (mirrors the PyTorch forward, dropout as identity)
# ---------------------------------------------------------------------------
def reference_forward(mod, query, key, value):
    B, Lq, H = query.shape
    nh, hd = mod.n_heads, mod.head_dim
    Q = query @ mod.wq.T + mod.bq
    K = key @ mod.wk.T + mod.bk
    V = value @ mod.wv.T + mod.bv
    Q = Q.reshape(B, -1, nh, hd).transpose(0, 2, 1, 3)
    K = K.reshape(B, -1, nh, hd).transpose(0, 2, 1, 3)
    V = V.reshape(B, -1, nh, hd).transpose(0, 2, 1, 3)
    att = jnp.einsum("bhqd,bhkd->bhqk", Q, K) / mod.scale
    att = jax.nn.softmax(att, axis=-1)
    x = jnp.einsum("bhqk,bhkd->bhqd", att, V)
    x = x.transpose(0, 2, 1, 3).reshape(B, -1, H)
    return x @ mod.wo.T + mod.bo


if __name__ == "__main__":
    # Small but lane-friendly shapes: hidden=128 exercises the fused-QKV column
    # BlockSpec path (H % 128 == 0); head_dim = 32.
    B, L, H, NH = 2, 16, 128, 4

    root = jax.random.PRNGKey(0)
    k_params, k_q, k_k, k_v = jax.random.split(root, 4)

    mod = MultiheadAttentionPallas(H, NH, k_params)

    query = jax.random.normal(k_q, (B, L, H), jnp.float32)
    key = jax.random.normal(k_k, (B, L, H), jnp.float32)
    value = jax.random.normal(k_v, (B, L, H), jnp.float32)

    # Cross-attention path (separate Q/K/V projection GEMMs).
    out = jax.block_until_ready(mod(query, key, value))
    ref = reference_forward(mod, query, key, value)
    assert out.shape == (B, L, H)
    assert jnp.allclose(out, ref, atol=5e-2, rtol=5e-2), "mismatch (cross-attn path)"

    # Self-attention path (fused [H, 3H] QKV GEMM + direct column-BlockSpec feed).
    out_sa = jax.block_until_ready(mod(query, query, query))
    ref_sa = reference_forward(mod, query, query, query)
    assert jnp.allclose(out_sa, ref_sa, atol=5e-2, rtol=5e-2), "mismatch (fused QKV path)"

    print("KERNEL_OK")
</pallas_src>

<mosaic_0001>
module attributes {stable_mosaic.version = 11 : i64} {
  func.func @_linear_kernel(%arg0: i32, %arg1: i32, %arg2: i32, %arg3: memref<32x128xf32, #tpu.memory_space<vmem>>, %arg4: memref<128x128xbf16, #tpu.memory_space<vmem>>, %arg5: memref<1x128xf32, #tpu.memory_space<vmem>>, %arg6: memref<32x128xbf16, #tpu.memory_space<vmem>>, %arg7: memref<32x128xf32, #tpu.memory_space<vmem>>) attributes {dimension_semantics = [#tpu.dimension_semantics<parallel>, #tpu.dimension_semantics<parallel>, #tpu.dimension_semantics<arbitrary>], iteration_bounds = array<i64: 1, 1, 1>, scalar_prefetch = 0 : i64, scratch_operands = 1 : i64, tpu.core_type = #tpu.core_type<tc>, window_params = [{transform_indices = @transform_0, window_bounds = array<i64: 32, 128>}, {transform_indices = @transform_1, window_bounds = array<i64: 128, 128>}, {transform_indices = @transform_2, window_bounds = array<i64: 1, 128>}, {transform_indices = @transform_3, window_bounds = array<i64: 32, 128>}]} {
    %c0_i32 = arith.constant 0 : i32
    %0 = arith.cmpi eq, %arg2, %c0_i32 : i32
    %1 = arith.extui %0 : i1 to i32
    %c0_i32_0 = arith.constant 0 : i32
    %2 = arith.cmpi ne, %1, %c0_i32_0 : i32
    scf.if %2 {
      %cst_10 = arith.constant 0.000000e+00 : f32
      %13 = vector.broadcast %cst_10 : f32 to vector<32x128xf32>
      %c0_11 = arith.constant 0 : index
      %c0_12 = arith.constant 0 : index
      %14 = vector.load %arg7[%c0_11, %c0_12] : memref<32x128xf32, #tpu.memory_space<vmem>>, vector<32x128xf32>
      tpu.vector_store %arg7[%c0_11, %c0_12], %13 {strides = array<i32>} : memref<32x128xf32, #tpu.memory_space<vmem>>, vector<32x128xf32>,
    } else {
    }
    %c0 = arith.constant 0 : index
    %c0_1 = arith.constant 0 : index
    %3 = vector.load %arg7[%c0, %c0_1] : memref<32x128xf32, #tpu.memory_space<vmem>>, vector<32x128xf32>
    %c0_2 = arith.constant 0 : index
    %c0_3 = arith.constant 0 : index
    %4 = vector.load %arg3[%c0_2, %c0_3] : memref<32x128xf32, #tpu.memory_space<vmem>>, vector<32x128xf32>
    %5 = arith.truncf %4 : vector<32x128xf32> to vector<32x128xbf16>
    %c0_4 = arith.constant 0 : index
    %c0_5 = arith.constant 0 : index
    %6 = vector.load %arg4[%c0_4, %c0_5] : memref<128x128xbf16, #tpu.memory_space<vmem>>, vector<128x128xbf16>
    %cst = arith.constant dense<0.000000e+00> : vector<32x128xf32>
    %7 = tpu.matmul %5, %6, %cst {dimension_numbers = #tpu.dot_dimension_numbers<[1], [0], [0], [1], [0, 0, 1, 1], [], []>} : vector<32x128xbf16>, vector<128x128xbf16>, vector<32x128xf32> -> vector<32x128xf32>
    %8 = arith.addf %3, %7 : vector<32x128xf32>
    %c0_6 = arith.constant 0 : index
    %c0_7 = arith.constant 0 : index
    %9 = vector.load %arg7[%c0_6, %c0_7] : memref<32x128xf32, #tpu.memory_space<vmem>>, vector<32x128xf32>
    tpu.vector_store %arg7[%c0_6, %c0_7], %8 {strides = array<i32>} : memref<32x128xf32, #tpu.memory_space<vmem>>, vector<32x128xf32>,
    %c0_i32_8 = arith.constant 0 : i32
    %10 = arith.cmpi eq, %arg2, %c0_i32_8 : i32
    %11 = arith.extui %10 : i1 to i32
    %c0_i32_9 = arith.constant 0 : i32
    %12 = arith.cmpi ne, %11, %c0_i32_9 : i32
    scf.if %12 {
      %c0_10 = arith.constant 0 : index
      %c0_11 = arith.constant 0 : index
      %13 = vector.load %arg7[%c0_10, %c0_11] : memref<32x128xf32, #tpu.memory_space<vmem>>, vector<32x128xf32>
      %c0_12 = arith.constant 0 : index
      %c0_13 = arith.constant 0 : index
      %14 = vector.load %arg5[%c0_12, %c0_13] : memref<1x128xf32, #tpu.memory_space<vmem>>, vector<1x128xf32>
      %15 = vector.broadcast %14 : vector<1x128xf32> to vector<32x128xf32>
      %16 = arith.addf %13, %15 : vector<32x128xf32>
      %17 = arith.truncf %16 : vector<32x128xf32> to vector<32x128xbf16>
      %c0_14 = arith.constant 0 : index
      %c0_15 = arith.constant 0 : index
      %18 = vector.load %arg6[%c0_14, %c0_15] : memref<32x128xbf16, #tpu.memory_space<vmem>>, vector<32x128xbf16>
      tpu.vector_store %arg6[%c0_14, %c0_15], %17 {strides = array<i32>} : memref<32x128xbf16, #tpu.memory_space<vmem>>, vector<32x128xbf16>,
    } else {
    }
    return
  }
  func.func @transform_0(%arg0: i32, %arg1: i32, %arg2: i32) -> (i32, i32) {
    %c0_i32 = arith.constant 0 : i32
    return %arg0, %arg2 : i32, i32
  }
  func.func @transform_1(%arg0: i32, %arg1: i32, %arg2: i32) -> (i32, i32) {
    %c0_i32 = arith.constant 0 : i32
    return %arg2, %arg1 : i32, i32
  }
  func.func @transform_2(%arg0: i32, %arg1: i32, %arg2: i32) -> (i32, i32) {
    %c0_i32 = arith.constant 0 : i32
    %c0_i32_0 = arith.constant 0 : i32
    return %c0_i32, %arg1 : i32, i32
  }
  func.func @transform_3(%arg0: i32, %arg1: i32, %arg2: i32) -> (i32, i32) {
    %c0_i32 = arith.constant 0 : i32
    return %arg0, %arg1 : i32, i32
  }
}

</mosaic_0001>

<bundles_post_ra>
// kernel: tpu_custom_call.1
= control target key start
LH: loop header
LB: loop body
LE: loop exit
PB: predicated region body
PF: predicated region fallthrough
CT: control target
= control target key end

     0   :  { %8 = vsyncpa [#allocation4], 0  ;;  %s423_s0 = inlined_call_operand.hbm [shape: f32[32,128], index: 0, kind: input, shape index: {}]   ;;  %s424_s1 = inlined_call_operand.hbm [shape: bf16[128,128], index: 1, kind: input, shape index: {}]   ;;  %s425_s2 = inlined_call_operand.vmem [shape: f32[1,128], index: 2, kind: input, shape index: {}]   ;;  %s426_s3 = inlined_call_operand.hbm [shape: bf16[32,128], index: 3, kind: output, shape index: {}]  }
   0x1   :  { %9 = vsyncpa [#allocation7], 0 }
   0x2   :  { %10 = vsyncpa [#allocation5], 0  ;;  %s378_s12 = smov [#allocation3]  }
   0x3   :  { %s16_s13 = sshll.u32 %s378_s12, 4  ;;  %s17_s13 = int_to_ptr.vmem [resolvable:$true] %s16_s13 }
   0x4   :  { %s320_s14 = scalar_lea.vmem %s17_s13, 512  ;;  %p325_p1 = scmp.lt.s32.totalorder %s17_s13, %s17_s13 }
   0x5   :  { %p321_p0 = scmp.ne.s32.totalorder %s17_s13, %s320_s14  ;;  %p326_p2 = scmp.lt.s32.totalorder %s320_s14, %s320_s14 }
   0x7   :  { %p327_p3 = por %p326_p2, %p325_p1 }
   0x9   :  { %p328_p4 = pnand %p327_p3, %p321_p0 }
   0xb   :  { %331 = shalt.err (!%p328_p4)
}
   0xc   :  { %s379_s15 = smov 128   ;;  %s380_s16 = smov 8  }
   0xd   :  { %22 = dma.hbm_to_vmem [thread:$0]  %s423_s0, 512, %s17_s13, [#allocation4], %s379_s15, %s379_s15, %s380_s16  }
   0xe   :  { %s381_s19 = smov [#allocation6]  }
   0xf   :  { %s28_s20 = sshll.u32 %s381_s19, 4  ;;  %s29_s20 = int_to_ptr.vmem [resolvable:$true] %s28_s20 }
  0x10   :  { %s340_s21 = scalar_lea.vmem %s29_s20, 1024  ;;  %p345_p6 = scmp.lt.s32.totalorder %s29_s20, %s29_s20 }
  0x11   :  { %p341_p5 = scmp.ne.s32.totalorder %s29_s20, %s340_s21  ;;  %p346_p7 = scmp.lt.s32.totalorder %s340_s21, %s340_s21 }
  0x13   :  { %p347_p8 = por %p346_p7, %p345_p6 }
  0x15   :  { %p348_p9 = pnand %p347_p8, %p341_p5 }
  0x17   :  { %351 = shalt.err (!%p348_p9)
}
  0x18   :  { %s382_s22 = smov 64   ;;  %s383_s23 = smov 4  }
  0x19   :  { %34 = dma.hbm_to_vmem [thread:$0]  %s424_s1, 1024, %s29_s20, [#allocation7], %s382_s22, %s382_s22, %s383_s23  }
  0x1a   :  { %372 = dma.done.wait [#allocation4], 512  }
  0x1b   :  { %373 = vsyncadd [#allocation4], 4294966784 }
  0x1c   :  { %374 = dma.done.wait [#allocation7], 1024  }
  0x1d   :  { %375 = vsyncadd [#allocation7], 4294966272  ;;  %v304_v0 = vld [vmem:[#allocation6 + $0x38] sm:$0xff]   ;;  %v305_v1 = vld [vmem:[#allocation6 + $0x30] sm:$0xff]   ;;  %s384_s26 = smov [#allocation8]  }
  0x1e   :  { %277 = vmatprep.subr.bf16.mxu0 %v304_v0  ;;  %v306_v2 = vld [vmem:[#allocation6 + $0x28] sm:$0xff]   ;;  %v307_v3 = vld [vmem:[#allocation6 + $0x20] sm:$0xff]   ;;  %v308_v7 = vld [vmem:[#allocation6 + $0x18] sm:$0xff]   ;;  %s226_s27 = sshll.u32 %s384_s26, 4  ;;  %s227_s27 = int_to_ptr.vmem [resolvable:$true] %s226_s27 }
  0x1f   :  { %278 = vmatpush3.bf16.msra.mxu0 %v304_v0  ;;  %v56_v4 = vld [vmem:[#allocation3] sm:$0xff]  ;;  %v57_v5 = vld [vmem:[#allocation3 + $0x8] sm:$0xff]  ;;  %v309_v8 = vld [vmem:[#allocation6 + $0x10] sm:$0xff]   ;;  %s352_s28 = scalar_lea.vmem %s227_s27, 256  ;;  %p357_p11 = scmp.lt.s32.totalorder %s227_s27, %s227_s27 }
  0x20   :  { %279 = vmatprep.subr.bf16.mxu0 %v305_v1  ;;  %v60_v6 = vpack.c.bf16 %v57_v5, %v56_v4  ;;  %v310_v9 = vld [vmem:[#allocation6 + $0x8] sm:$0xff]   ;;  %v311_v10 = vld [vmem:[#allocation6] sm:$0xff]   ;;  %v58_v11 = vld [vmem:[#allocation3 + $0x10] sm:$0xff]  ;;  %p353_p10 = scmp.ne.s32.totalorder %s227_s27, %s352_s28  ;;  %p358_p12 = scmp.lt.s32.totalorder %s352_s28, %s352_s28 }
  0x21   :  { %v59_v12 = vld [vmem:[#allocation3 + $0x18] sm:$0xff]  ;;  %v247_v15 = vld [vmem:[%s425_s2] ss:$0 sm:$0xff] }
  0x22   :  { %293 = vmatprep.mubr.bf16.mxu0 %v60_v6  ;;  %v61_v13 = vpack.c.bf16 %v59_v12, %v58_v11  ;;  %p359_p13 = por %p358_p12, %p357_p11 }
  0x23   :  { %280 = vmatpush3.bf16.msra.mxu0 %v305_v1 }
  0x24   :  { %281 = vmatprep.subr.bf16.mxu0 %v306_v2  ;;  %p360_p0 = pnand %p359_p13, %p353_p10 }
  0x27   :  { %282 = vmatpush3.bf16.msra.mxu0 %v306_v2 }
  0x28   :  { %283 = vmatprep.subr.bf16.mxu0 %v307_v3 }
  0x2b   :  { %284 = vmatpush3.bf16.msra.mxu0 %v307_v3 }
  0x2c   :  { %285 = vmatprep.subr.bf16.mxu0 %v308_v7 }
  0x2f   :  { %286 = vmatpush3.bf16.msra.mxu0 %v308_v7 }
  0x30   :  { %287 = vmatprep.subr.bf16.mxu0 %v309_v8 }
  0x33   :  { %288 = vmatpush3.bf16.msra.mxu0 %v309_v8 }
  0x34   :  { %289 = vmatprep.subr.bf16.mxu0 %v310_v9 }
  0x37   :  { %290 = vmatpush3.bf16.msra.mxu0 %v310_v9 }
  0x38   :  { %291 = vmatprep.subr.bf16.mxu0 %v311_v10 }
  0x3b   :  { %292 = vmatpush3.bf16.msra.mxu0 %v311_v10 }
  0x3e   :  { %294 = vmatmul.mubr.bf16.vlgmr.msra.gmra.mxu0 %v61_v13 }
  0xfe   :  { %v295_v14 = vpop.f32.mrf.mxu0 }
  0xff   :  { %v199_v18 = vadd.f32 %v295_v14, %v247_v15 }
 0x100   :  { %v160_v16 = vpop.f32.mrf.mxu0 }
 0x101   :  { %v197_v21 = vadd.f32 %v247_v15, %v160_v16 }
 0x102   :  { %v296_v17 = vpop.f32.mrf.mxu0 }
 0x103   :  { %v200_v19 = vadd.f32 %v296_v17, %v247_v15 }
 0x104   :  { %v163_v20 = vpop.f32.mrf.mxu0 }
 0x105   :  { %v264_v22 = vpack.c.bf16 %v200_v19, %v199_v18  ;;  %v198_v23 = vadd.f32 %v247_v15, %v163_v20 }
 0x107   :  { %266 = vst [vmem:[#allocation8 + $0x8] sm:$0xff] %v264_v22   ;;  %v259_v24 = vpack.c.bf16 %v198_v23, %v197_v21 }
 0x109   :  { %260 = vst [vmem:[#allocation8] sm:$0xff] %v259_v24  }
 0x10a   :  { %363 = shalt.err (!%p360_p0)
}
 0x10b   :  { %232 = dma.vmem_to_hbm [thread:$0]  %s227_s27, 256, %s426_s3, [#allocation5], %s382_s22, %s382_s22, %s383_s23  }
 0x10c   :  { %376 = dma.done.wait [#allocation5], 256  }
 0x10d   :  { %377 = vsyncadd [#allocation5], 4294967040 }
 0x10e   :  { %236 = vsyncpa [#allocation4], 1 }
 0x10f   :  { %237 = vsyncpa [#allocation7], 1 }
 0x110   :  { %238 = vsyncpa [#allocation5], 1 }

</bundles_post_ra>
